<compile_context>
chip_gen: v7x
topology: tpu7x:2x2x1
jax: 0.10.0
libtpu: 0.0.40
codegen_flags: <defaults>
</compile_context>

<pallas_src>
import jax
import jax.numpy as jnp
from jax.experimental import pallas as pl
from jax.experimental.pallas import tpu as pltpu


def _spatial_attn_kernel(x_ref, w0_ref, b0_ref, w1_ref, b1_ref, wf_ref,
                         rept_ref, out_ref):
    # x_ref: (Bt, C, S) f32 block; out_ref: (Bt, C) f32 lane-dense block.
    w0 = w0_ref[...]       # (H0, C)
    b0 = b0_ref[...]       # (H0, 1)
    w1 = w1_ref[...]       # (H1, H0)
    b1 = b1_ref[...]       # (H1, 1)
    wf = wf_ref[...]       # (NH, H1)
    rept = rept_ref[...]   # (NH, C) 0/1: rept[h, c] = (h == c % num_heads)
    bt = x_ref.shape[0]

    def body(i, carry):
        x = x_ref[i]                                               # (C, S)

        # 1x1 conv #0 + ReLU: (H0, C) @ (C, S) -> (H0, S), f32 MXU.
        h = jnp.dot(w0, x, preferred_element_type=jnp.float32)
        h = jnp.maximum(h + b0, 0.0)

        # 1x1 conv #1 + ReLU: (H1, H0) @ (H0, S) -> (H1, S).
        h = jnp.dot(w1, h, preferred_element_type=jnp.float32)
        h = jnp.maximum(h + b1, 0.0)

        # final 1x1 conv (no bias): (NH, H1) @ (H1, S) -> per-head logits.
        logits = jnp.dot(wf, h, preferred_element_type=jnp.float32)

        # softmax over the flattened spatial (lane) axis, in f32.
        m = jnp.max(logits, axis=-1, keepdims=True)
        e = jnp.exp(logits - m)
        attn = e * pl.reciprocal(jnp.sum(e, axis=-1, keepdims=True),
                                 approx=True)                      # (NH, S)

        # Spatial reduction on the MXU (K = S, the only well-shaped matmul):
        # y[h, c] = sum_s attn[h, s] * x[c, s].
        y = jax.lax.dot_general(attn, x,
                                dimension_numbers=(((1,), (1,)), ((), ())),
                                preferred_element_type=jnp.float32)  # (NH, C)

        # head -> channel selection (channel c uses head c % NH) + tiny
        # sublane reduce; result is already a lane-dense (1, C) row.
        row = jnp.sum(rept * y, axis=0, keepdims=True)               # (1, C)
        out_ref[pl.ds(i, 1), :] = row.astype(out_ref.dtype)
        return carry

    jax.lax.fori_loop(0, bt, body, 0, unroll=True)


def spatial_attn_pallas(x_nchw, params, num_heads, batch_tile=None):
    """x_nchw: (B, C, H, W) float32.  params: 1x1-conv weights/biases."""
    B, C, H, W = x_nchw.shape
    S = H * W
    assert C % num_heads == 0

    if batch_tile is None:
        # Keep >= 2 "parallel" grid steps (v7x megacore) when the batch allows
        # a sublane-aligned split; otherwise one step that loops over B
        # in-kernel (demo sizes).
        batch_tile = B // 2 if (B % 16 == 0) else B
    assert B % batch_tile == 0
    n_steps = B // batch_tile

    # Free, contiguous reshape: NCHW is already (B, C, H*W) in memory.
    x_bcs = x_nchw.reshape(B, C, S)

    f32 = jnp.float32
    # Weights in (out, in) layout so the kernel never transposes.
    w0 = params["w0"].astype(f32)                  # (H0, C)
    w1 = params["w1"].astype(f32)                  # (H1, H0)
    wf = params["wf"].astype(f32)                  # (NH, H1)
    # Biases as (out, 1) for lane-broadcast adds.
    b0 = params["b0"].reshape(-1, 1).astype(f32)   # (H0, 1)
    b1 = params["b1"].reshape(-1, 1).astype(f32)   # (H1, 1)
    # 0/1 head-selection matrix (NH, C): rept[h, c] = (h == c % num_heads).
    rept = (jnp.arange(num_heads)[:, None]
            == (jnp.arange(C)[None, :] % num_heads)).astype(f32)

    H0, H1, NH = w0.shape[0], w1.shape[0], wf.shape[0]
    const2d = lambda b: (0, 0)

    out = pl.pallas_call(
        _spatial_attn_kernel,
        out_shape=jax.ShapeDtypeStruct((B, C), x_nchw.dtype),
        grid_spec=pltpu.PrefetchScalarGridSpec(
            num_scalar_prefetch=0,
            grid=(n_steps,),
            in_specs=[
                pl.BlockSpec((batch_tile, C, S), lambda b: (b, 0, 0)),  # x
                pl.BlockSpec((H0, C), const2d),   # w0
                pl.BlockSpec((H0, 1), const2d),   # b0
                pl.BlockSpec((H1, H0), const2d),  # w1
                pl.BlockSpec((H1, 1), const2d),   # b1
                pl.BlockSpec((NH, H1), const2d),  # wf
                pl.BlockSpec((NH, C), const2d),   # rept
            ],
            out_specs=pl.BlockSpec((batch_tile, C), lambda b: (b, 0)),
        ),
        compiler_params=pltpu.CompilerParams(
            dimension_semantics=("parallel",)),
    )(x_bcs, w0, b0, w1, b1, wf, rept)
    return out


def spatial_attn_reference(x_nchw, params, num_heads):
    """Pure-JAX f32 reference mirroring the PyTorch forward."""
    B, C, H, W = x_nchw.shape
    x = x_nchw.reshape(B, C, H * W)                               # (B, C, S)
    h = jnp.maximum(jnp.einsum("oc,bcs->bos", params["w0"], x)
                    + params["b0"][None, :, None], 0.0)
    h = jnp.maximum(jnp.einsum("oi,bis->bos", params["w1"], h)
                    + params["b1"][None, :, None], 0.0)
    logits = jnp.einsum("oi,bis->bos", params["wf"], h)           # (B, NH, S)
    attn = jax.nn.softmax(logits, axis=-1)                        # softmax over S
    attn_full = jnp.tile(attn, (1, C // num_heads, 1))            # channel c -> head c % NH
    return jnp.sum(attn_full * x, axis=-1)                        # (B, C)


if __name__ == "__main__":
    # Small shapes consistent with the module: inp_dim=8, hidden_sizes=[16, 8],
    # num_heads=4, spatial 16x16, batch 2.
    B, C, H, W = 2, 8, 16, 16
    hidden_sizes = [16, 8]
    num_heads = 4
    assert C % num_heads == 0

    key = jax.random.PRNGKey(0)
    kx, k0, kb0, k1, kb1, kf = jax.random.split(key, 6)

    x = jax.random.normal(kx, (B, C, H, W), dtype=jnp.float32)
    params = {
        "w0": 0.1 * jax.random.normal(k0, (hidden_sizes[0], C), jnp.float32),
        "b0": 0.1 * jax.random.normal(kb0, (hidden_sizes[0],), jnp.float32),
        "w1": 0.1 * jax.random.normal(k1, (hidden_sizes[1], hidden_sizes[0]),
                                      jnp.float32),
        "b1": 0.1 * jax.random.normal(kb1, (hidden_sizes[1],), jnp.float32),
        "wf": 0.1 * jax.random.normal(kf, (num_heads, hidden_sizes[1]),
                                      jnp.float32),
    }

    out = spatial_attn_pallas(x, params, num_heads)
    out = jax.block_until_ready(out)

    ref = spatial_attn_reference(x, params, num_heads)
    assert out.shape == (B, C)
    # All matmuls are f32 now; the only approximation left is the EUP
    # approximate reciprocal in the softmax denominator (~1e-3 relative).
    assert jnp.allclose(out, ref, rtol=3e-3, atol=1e-4), "mismatch vs reference"

    print("KERNEL_OK")
</pallas_src>

<mosaic_0001>
module attributes {stable_mosaic.version = 11 : i64} {
  func.func @_spatial_attn_kernel(%arg0: i32, %arg1: memref<2x8x256xf32, #tpu.memory_space<vmem>>, %arg2: memref<16x8xf32, #tpu.memory_space<vmem>>, %arg3: memref<16x1xf32, #tpu.memory_space<vmem>>, %arg4: memref<8x16xf32, #tpu.memory_space<vmem>>, %arg5: memref<8x1xf32, #tpu.memory_space<vmem>>, %arg6: memref<4x8xf32, #tpu.memory_space<vmem>>, %arg7: memref<4x8xf32, #tpu.memory_space<vmem>>, %arg8: memref<2x8xf32, #tpu.memory_space<vmem>>) attributes {dimension_semantics = [#tpu.dimension_semantics<parallel>], iteration_bounds = array<i64: 1>, scalar_prefetch = 0 : i64, scratch_operands = 0 : i64, tpu.core_type = #tpu.core_type<tc>, window_params = [{transform_indices = @transform_0, window_bounds = array<i64: 2, 8, 256>}, {pipeline_mode = #tpu.pipeline_mode<synchronous>, transform_indices = @transform_1, window_bounds = array<i64: 16, 8>}, {pipeline_mode = #tpu.pipeline_mode<synchronous>, transform_indices = @transform_2, window_bounds = array<i64: 16, 1>}, {pipeline_mode = #tpu.pipeline_mode<synchronous>, transform_indices = @transform_3, window_bounds = array<i64: 8, 16>}, {pipeline_mode = #tpu.pipeline_mode<synchronous>, transform_indices = @transform_4, window_bounds = array<i64: 8, 1>}, {pipeline_mode = #tpu.pipeline_mode<synchronous>, transform_indices = @transform_5, window_bounds = array<i64: 4, 8>}, {pipeline_mode = #tpu.pipeline_mode<synchronous>, transform_indices = @transform_6, window_bounds = array<i64: 4, 8>}, {transform_indices = @transform_7, window_bounds = array<i64: 2, 8>}]} {
    %c0 = arith.constant 0 : index
    %c0_0 = arith.constant 0 : index
    %0 = vector.load %arg2[%c0, %c0_0] : memref<16x8xf32, #tpu.memory_space<vmem>>, vector<16x8xf32>
    %c0_1 = arith.constant 0 : index
    %c0_2 = arith.constant 0 : index
    %1 = vector.load %arg3[%c0_1, %c0_2] : memref<16x1xf32, #tpu.memory_space<vmem>>, vector<16x1xf32>
    %c0_3 = arith.constant 0 : index
    %c0_4 = arith.constant 0 : index
    %2 = vector.load %arg4[%c0_3, %c0_4] : memref<8x16xf32, #tpu.memory_space<vmem>>, vector<8x16xf32>
    %c0_5 = arith.constant 0 : index
    %c0_6 = arith.constant 0 : index
    %3 = vector.load %arg5[%c0_5, %c0_6] : memref<8x1xf32, #tpu.memory_space<vmem>>, vector<8x1xf32>
    %c0_7 = arith.constant 0 : index
    %c0_8 = arith.constant 0 : index
    %4 = vector.load %arg6[%c0_7, %c0_8] : memref<4x8xf32, #tpu.memory_space<vmem>>, vector<4x8xf32>
    %c0_9 = arith.constant 0 : index
    %c0_10 = arith.constant 0 : index
    %5 = vector.load %arg7[%c0_9, %c0_10] : memref<4x8xf32, #tpu.memory_space<vmem>>, vector<4x8xf32>
    %c0_i32 = arith.constant 0 : i32
    %6 = arith.index_cast %c0_i32 : i32 to index
    %c0_11 = arith.constant 0 : index
    %c0_12 = arith.constant 0 : index
    %7 = vector.load %arg1[%6, %c0_11, %c0_12] : memref<2x8x256xf32, #tpu.memory_space<vmem>>, vector<1x8x256xf32>
    %8 = vector.shape_cast %7 : vector<1x8x256xf32> to vector<8x256xf32>
    %cst = arith.constant dense<0.000000e+00> : vector<16x256xf32>
    %9 = tpu.matmul %0, %8, %cst {dimension_numbers = #tpu.dot_dimension_numbers<[1], [0], [0], [1], [0, 0, 1, 1], [], []>} : vector<16x8xf32>, vector<8x256xf32>, vector<16x256xf32> -> vector<16x256xf32>
    %10 = vector.broadcast %1 : vector<16x1xf32> to vector<16x256xf32>
    %11 = arith.addf %9, %10 : vector<16x256xf32>
    %cst_13 = arith.constant 0.000000e+00 : f32
    %12 = vector.broadcast %cst_13 : f32 to vector<16x256xf32>
    %13 = arith.maximumf %11, %12 : vector<16x256xf32>
    %cst_14 = arith.constant dense<0.000000e+00> : vector<8x256xf32>
    %14 = tpu.matmul %2, %13, %cst_14 {dimension_numbers = #tpu.dot_dimension_numbers<[1], [0], [0], [1], [0, 0, 1, 1], [], []>} : vector<8x16xf32>, vector<16x256xf32>, vector<8x256xf32> -> vector<8x256xf32>
    %15 = vector.broadcast %3 : vector<8x1xf32> to vector<8x256xf32>
    %16 = arith.addf %14, %15 : vector<8x256xf32>
    %cst_15 = arith.constant 0.000000e+00 : f32
    %17 = vector.broadcast %cst_15 : f32 to vector<8x256xf32>
    %18 = arith.maximumf %16, %17 : vector<8x256xf32>
    %cst_16 = arith.constant dense<0.000000e+00> : vector<4x256xf32>
    %19 = tpu.matmul %4, %18, %cst_16 {dimension_numbers = #tpu.dot_dimension_numbers<[1], [0], [0], [1], [0, 0, 1, 1], [], []>} : vector<4x8xf32>, vector<8x256xf32>, vector<4x256xf32> -> vector<4x256xf32>
    %cst_17 = arith.constant dense<0xFF800000> : vector<4xf32>
    %20 = vector.multi_reduction <maximumf>, %19, %cst_17 [1] : vector<4x256xf32> to vector<4xf32>
    %21 = vector.shape_cast %20 : vector<4xf32> to vector<4x1xf32>
    %22 = vector.broadcast %21 : vector<4x1xf32> to vector<4x256xf32>
    %23 = arith.subf %19, %22 : vector<4x256xf32>
    %24 = math.exp %23 : vector<4x256xf32>
    %cst_18 = arith.constant dense<0.000000e+00> : vector<4xf32>
    %25 = vector.multi_reduction <add>, %24, %cst_18 [1] : vector<4x256xf32> to vector<4xf32>
    %26 = vector.shape_cast %25 : vector<4xf32> to vector<4x1xf32>
    %27 = tpu.reciprocal %26 {approx = true} : vector<4x1xf32> -> vector<4x1xf32>
    %28 = vector.broadcast %27 : vector<4x1xf32> to vector<4x256xf32>
    %29 = arith.mulf %24, %28 : vector<4x256xf32>
    %cst_19 = arith.constant dense<0.000000e+00> : vector<4x8xf32>
    %30 = tpu.matmul %29, %8, %cst_19 {dimension_numbers = #tpu.dot_dimension_numbers<[1], [1], [0], [0], [0, 0, 1, 0], [], []>} : vector<4x256xf32>, vector<8x256xf32>, vector<4x8xf32> -> vector<4x8xf32>
    %31 = arith.mulf %5, %30 : vector<4x8xf32>
    %cst_20 = arith.constant dense<0.000000e+00> : vector<8xf32>
    %32 = vector.multi_reduction <add>, %31, %cst_20 [0] : vector<4x8xf32> to vector<8xf32>
    %33 = vector.shape_cast %32 : vector<8xf32> to vector<1x8xf32>
    %34 = arith.index_cast %c0_i32 : i32 to index
    %c0_21 = arith.constant 0 : index
    %35 = vector.load %arg8[%34, %c0_21] : memref<2x8xf32, #tpu.memory_space<vmem>>, vector<1x8xf32>
    tpu.vector_store %arg8[%34, %c0_21], %33 {strides = array<i32>} : memref<2x8xf32, #tpu.memory_space<vmem>>, vector<1x8xf32>,
    %c1_i32 = arith.constant 1 : i32
    %36 = arith.index_cast %c1_i32 : i32 to index
    %c0_22 = arith.constant 0 : index
    %c0_23 = arith.constant 0 : index
    %37 = vector.load %arg1[%36, %c0_22, %c0_23] : memref<2x8x256xf32, #tpu.memory_space<vmem>>, vector<1x8x256xf32>
    %38 = vector.shape_cast %37 : vector<1x8x256xf32> to vector<8x256xf32>
    %cst_24 = arith.constant dense<0.000000e+00> : vector<16x256xf32>
    %39 = tpu.matmul %0, %38, %cst_24 {dimension_numbers = #tpu.dot_dimension_numbers<[1], [0], [0], [1], [0, 0, 1, 1], [], []>} : vector<16x8xf32>, vector<8x256xf32>, vector<16x256xf32> -> vector<16x256xf32>
    %40 = vector.broadcast %1 : vector<16x1xf32> to vector<16x256xf32>
    %41 = arith.addf %39, %40 : vector<16x256xf32>
    %cst_25 = arith.constant 0.000000e+00 : f32
    %42 = vector.broadcast %cst_25 : f32 to vector<16x256xf32>
    %43 = arith.maximumf %41, %42 : vector<16x256xf32>
    %cst_26 = arith.constant dense<0.000000e+00> : vector<8x256xf32>
    %44 = tpu.matmul %2, %43, %cst_26 {dimension_numbers = #tpu.dot_dimension_numbers<[1], [0], [0], [1], [0, 0, 1, 1], [], []>} : vector<8x16xf32>, vector<16x256xf32>, vector<8x256xf32> -> vector<8x256xf32>
    %45 = vector.broadcast %3 : vector<8x1xf32> to vector<8x256xf32>
    %46 = arith.addf %44, %45 : vector<8x256xf32>
    %cst_27 = arith.constant 0.000000e+00 : f32
    %47 = vector.broadcast %cst_27 : f32 to vector<8x256xf32>
    %48 = arith.maximumf %46, %47 : vector<8x256xf32>
    %cst_28 = arith.constant dense<0.000000e+00> : vector<4x256xf32>
    %49 = tpu.matmul %4, %48, %cst_28 {dimension_numbers = #tpu.dot_dimension_numbers<[1], [0], [0], [1], [0, 0, 1, 1], [], []>} : vector<4x8xf32>, vector<8x256xf32>, vector<4x256xf32> -> vector<4x256xf32>
    %cst_29 = arith.constant dense<0xFF800000> : vector<4xf32>
    %50 = vector.multi_reduction <maximumf>, %49, %cst_29 [1] : vector<4x256xf32> to vector<4xf32>
    %51 = vector.shape_cast %50 : vector<4xf32> to vector<4x1xf32>
    %52 = vector.broadcast %51 : vector<4x1xf32> to vector<4x256xf32>
    %53 = arith.subf %49, %52 : vector<4x256xf32>
    %54 = math.exp %53 : vector<4x256xf32>
    %cst_30 = arith.constant dense<0.000000e+00> : vector<4xf32>
    %55 = vector.multi_reduction <add>, %54, %cst_30 [1] : vector<4x256xf32> to vector<4xf32>
    %56 = vector.shape_cast %55 : vector<4xf32> to vector<4x1xf32>
    %57 = tpu.reciprocal %56 {approx = true} : vector<4x1xf32> -> vector<4x1xf32>
    %58 = vector.broadcast %57 : vector<4x1xf32> to vector<4x256xf32>
    %59 = arith.mulf %54, %58 : vector<4x256xf32>
    %cst_31 = arith.constant dense<0.000000e+00> : vector<4x8xf32>
    %60 = tpu.matmul %59, %38, %cst_31 {dimension_numbers = #tpu.dot_dimension_numbers<[1], [1], [0], [0], [0, 0, 1, 0], [], []>} : vector<4x256xf32>, vector<8x256xf32>, vector<4x8xf32> -> vector<4x8xf32>
    %61 = arith.mulf %5, %60 : vector<4x8xf32>
    %cst_32 = arith.constant dense<0.000000e+00> : vector<8xf32>
    %62 = vector.multi_reduction <add>, %61, %cst_32 [0] : vector<4x8xf32> to vector<8xf32>
    %63 = vector.shape_cast %62 : vector<8xf32> to vector<1x8xf32>
    %64 = arith.index_cast %c1_i32 : i32 to index
    %c0_33 = arith.constant 0 : index
    %65 = vector.load %arg8[%64, %c0_33] : memref<2x8xf32, #tpu.memory_space<vmem>>, vector<1x8xf32>
    tpu.vector_store %arg8[%64, %c0_33], %63 {strides = array<i32>} : memref<2x8xf32, #tpu.memory_space<vmem>>, vector<1x8xf32>,
    %c2_i32 = arith.constant 2 : i32
    return
  }
  func.func @transform_0(%arg0: i32) -> (i32, i32, i32) {
    %c0_i32 = arith.constant 0 : i32
    %c0_i32_0 = arith.constant 0 : i32
    %c0_i32_1 = arith.constant 0 : i32
    return %arg0, %c0_i32, %c0_i32_0 : i32, i32, i32
  }
  func.func @transform_1(%arg0: i32) -> (i32, i32) {
    %c0_i32 = arith.constant 0 : i32
    %c0_i32_0 = arith.constant 0 : i32
    %c0_i32_1 = arith.constant 0 : i32
    return %c0_i32, %c0_i32_0 : i32, i32
  }
  func.func @transform_2(%arg0: i32) -> (i32, i32) {
    %c0_i32 = arith.constant 0 : i32
    %c0_i32_0 = arith.constant 0 : i32
    %c0_i32_1 = arith.constant 0 : i32
    return %c0_i32, %c0_i32_0 : i32, i32
  }
  func.func @transform_3(%arg0: i32) -> (i32, i32) {
    %c0_i32 = arith.constant 0 : i32
    %c0_i32_0 = arith.constant 0 : i32
    %c0_i32_1 = arith.constant 0 : i32
    return %c0_i32, %c0_i32_0 : i32, i32
  }
  func.func @transform_4(%arg0: i32) -> (i32, i32) {
    %c0_i32 = arith.constant 0 : i32
    %c0_i32_0 = arith.constant 0 : i32
    %c0_i32_1 = arith.constant 0 : i32
    return %c0_i32, %c0_i32_0 : i32, i32
  }
  func.func @transform_5(%arg0: i32) -> (i32, i32) {
    %c0_i32 = arith.constant 0 : i32
    %c0_i32_0 = arith.constant 0 : i32
    %c0_i32_1 = arith.constant 0 : i32
    return %c0_i32, %c0_i32_0 : i32, i32
  }
  func.func @transform_6(%arg0: i32) -> (i32, i32) {
    %c0_i32 = arith.constant 0 : i32
    %c0_i32_0 = arith.constant 0 : i32
    %c0_i32_1 = arith.constant 0 : i32
    return %c0_i32, %c0_i32_0 : i32, i32
  }
  func.func @transform_7(%arg0: i32) -> (i32, i32) {
    %c0_i32 = arith.constant 0 : i32
    %c0_i32_0 = arith.constant 0 : i32
    return %arg0, %c0_i32 : i32, i32
  }
}

</mosaic_0001>

<bundles_post_ra>
// kernel: tpu_custom_call.1
= control target key start
LH: loop header
LB: loop body
LE: loop exit
PB: predicated region body
PF: predicated region fallthrough
CT: control target
= control target key end

     0   :  { %vm47_vm0 = vcmask 64512   ;;  %v791_v3 = vmov 0.0   ;;  %v792_v5 = vmov 0   ;;  %s924_s0 = inlined_call_operand.vmem [shape: f32[2,8,256], index: 0, kind: input, shape index: {}]   ;;  %s925_s1 = inlined_call_operand.vmem [shape: f32[16,8], index: 1, kind: input, shape index: {}]   ;;  %s926_s2 = inlined_call_operand.vmem [shape: f32[16,1], index: 2, kind: input, shape index: {}]   ;;  %s927_s3 = inlined_call_operand.vmem [shape: f32[8,16], index: 3, kind: input, shape index: {}]   ;;  %s928_s4 = inlined_call_operand.vmem [shape: f32[8,1], index: 4, kind: input, shape index: {}]   ;;  %s929_s5 = inlined_call_operand.vmem [shape: f32[4,8], index: 5, kind: input, shape index: {}]   ;;  %s930_s6 = inlined_call_operand.vmem [shape: f32[4,8], index: 6, kind: input, shape index: {}]   ;;  %s931_s7 = inlined_call_operand.hbm [shape: f32[2,8], index: 7, kind: output, shape index: {}]  }
   0x1   :  { %v36_v0 = vld [vmem:[%s924_s0 + $0x8] sm:$0xff]  ;;  %v35_v1 = vld [vmem:[%s924_s0] sm:$0xff]  ;;  %118 = vmatprep.mubr.f32.mxu0 %v791_v3  ;;  %753 = vset.pattern.permute.xlu0 %v792_v5 }
   0x2   :  { %v27_v2 = vld [vmem:[%s925_s1] sm:$0xff]  ;;  %54 = vmatprep.subr.mxu0 %v36_v0 }
   0x3   :  { %v29_v4 = vld [vmem:[%s926_s2] sm:$0xff]  ;;  %55 = vmatpush1.msra.mxu0 %v35_v1 }
   0x4   :  { %12 = vsyncpa [#allocation3], 0  ;;  %732 = vmatmul.mubr.msk.f32.vlgmr.msra.gmra.mrb[0].mxu0 %vm47_vm0, %v27_v2  ;;  %39 = vperm.xlu0 %753, %v29_v4   ;;  %v28_v6 = vld [vmem:[%s925_s1 + $0x8] sm:$0xff]  ;;  %v32_v8 = vld [vmem:[%s928_s4] sm:$0xff]  ;;  %vm140_vm1 = vcmask 130048   ;;  %vm291_vm2 = vcmask 1043456  }
   0x5   :  { %124 = vmatprep.mubr.f32.mxu0 %v791_v3  ;;  %v30_v7 = vld [vmem:[%s926_s2 + $0x8] sm:$0xff]  ;;  %208 = vmatprep.mubr.f32.mxu1 %v791_v3  ;;  %v863_v25 = vld [vmem:[%s927_s3] sm:$0xff]  ;;  %v737_v34 = vld [vmem:[%s924_s0 + $0x18] sm:$0xff]  ;;  %vm382_vm3 = vcmask 60416   ;;  %vm390_vm4 = vcmask 57344  }
   0x6   :  { %754 = vset.pattern.permute.xlu1 %v792_v5  ;;  %311 = vmatprep.subr.mxu0 %v36_v0  ;;  %v875_v33 = vld [vmem:[%s929_s5] sm:$0xf]  ;;  %v736_v35 = vld [vmem:[%s924_s0 + $0x10] sm:$0xff] }
   0x7   :  { %137 = vperm.xlu1 %754, %v32_v8  }
   0x8   :  { %733 = vmatmul.mubr.msk.f32.gmra.mrb[2].mxu0 %vm47_vm0, %v28_v6  ;;  %44 = vperm.xlu0 %753, %v30_v7  }
   0xa   :  { %312 = vmatpush1.xpose.msra.mxu0 %v35_v1 }
  0x83   :  { %v40_v9 = vpop.permute.xlu0 %39 }
  0x86   :  { %v868_v26 = vpop.permute.xlu1 %137 }
  0x87   :  { %v45_v13 = vpop.permute.xlu0 %44 }
  0xd7   :  { %v120_v10 = vpop.f32.mrb[0].mxu0 }
  0xd8   :  { %v122_v11 = vpop.f32.mrb[1].mxu0  ;;  %v121_v12 = vadd.f32 %v120_v10, %v40_v9 }
  0xd9   :  { %v123_v14 = vadd.f32 %v122_v11, %v40_v9 }
  0xda   :  { %v131_v19 = vmax.f32 %v121_v12, 0.0 }
  0xdb   :  { %v126_v15 = vpop.f32.mrb[2].mxu0  ;;  %v132_v21 = vmax.f32 %v123_v14, 0.0 }
  0xdc   :  { %v127_v16 = vadd.f32 %v126_v15, %v45_v13  ;;  %v128_v17 = vpop.f32.mrb[3].mxu0 }
  0xdd   :  { %v129_v18 = vadd.f32 %v128_v17, %v45_v13 }
  0xde   :  { %v133_v20 = vmax.f32 %v127_v16, 0.0 }
  0xdf   :  { %v134_v22 = vmax.f32 %v129_v18, 0.0 }
  0xe0   :  { %v744_v23 = vpack.c.bf16 %v133_v20, %v131_v19 }
  0xe1   :  { %v742_v24 = vpack.c.bf16 %v134_v22, %v132_v21 }
  0xe3   :  { %743 = vmatprep.subr.bf16.mxu1 %v742_v24 }
  0xe4   :  { %745 = vmatpush1.bf16.msra.mxu1 %v744_v23 }
  0xe7   :  { %734 = vmatmul.mubr.msk.f32.vlgmr.msra.gmra.mrb[0].mxu1 %vm140_vm1, %v863_v25 }
  0xe8   :  { %284 = vmatprep.mubr.f32.mxu1 %v791_v3 }
 0x1ba   :  { %v210_v27 = vpop.f32.mrb[0].mxu1 }
 0x1bb   :  { %v211_v28 = vadd.f32 %v210_v27, %v868_v26  ;;  %v212_v29 = vpop.f32.mrb[1].mxu1 }
 0x1bc   :  { %v213_v30 = vadd.f32 %v212_v29, %v868_v26 }
 0x1bd   :  { %v215_v32 = vmax.f32 %v211_v28, 0.0 }
 0x1be   :  { %v216_v31 = vmax.f32 %v213_v30, 0.0 }
 0x1c0   :  { %220 = vmatprep.subr.mxu1 %v216_v31 }
 0x1c1   :  { %221 = vmatpush1.msra.mxu1 %v215_v32 }
 0x1c2   :  { %735 = vmatmul.mubr.msk.f32.vlgmr.msra.gmra.mrb[2].mxu1 %vm47_vm0, %v875_v33  ;;  %395 = vmatprep.subr.mxu1 %v737_v34 }
 0x1c3   :  { %396 = vmatpush1.msra.mxu1 %v736_v35  ;;  %459 = vmatprep.mubr.f32.mxu1 %v791_v3 }
 0x1c4   :  { %639 = vmatprep.subr.mxu1 %v737_v34 }
 0x1c6   :  { %738 = vmatmul.mubr.msk.f32.vlgmr.msra.gmra.mrb[4].mxu1 %vm47_vm0, %v27_v2 }
 0x1c7   :  { %465 = vmatprep.mubr.f32.mxu1 %v791_v3 }
 0x1ca   :  { %739 = vmatmul.mubr.msk.f32.gmra.mrb[6].mxu1 %vm47_vm0, %v28_v6  ;;  %v34_v6 = vld [vmem:[%s930_s6] sm:$0xf]  ;;  %s793_s6 = smov [#allocation2]  }
 0x1cb   :  { %640 = vmatpush1.xpose.msra.mxu1 %v736_v35  ;;  %s724_s19 = sshll.u32 %s793_s6, 4  ;;  %s725_s19 = int_to_ptr.vmem [resolvable:$true] %s724_s19 }
 0x1cc   :  { %s767_s20 = scalar_lea.vmem %s725_s19, 32  ;;  %p772_p1 = scmp.lt.s32.totalorder %s725_s19, %s725_s19 }
 0x1cd   :  { %p768_p0 = scmp.ne.s32.totalorder %s725_s19, %s767_s20  ;;  %p773_p2 = scmp.lt.s32.totalorder %s767_s20, %s767_s20 }
 0x1cf   :  { %p774_p3 = por %p773_p2, %p772_p1 }
 0x1d1   :  { %p775_p4 = pnand %p774_p3, %p768_p0 }
 0x295   :  { %v286_v36 = vpop.f32.mrb[2].mxu1 }
 0x296   :  { %v292_v37 = vsel %vm291_vm2, %v286_v36, -inf  ;;  %v288_v38 = vpop.f32.mrb[3].mxu1 }
 0x297   :  { %v293_v39 = vsel %vm291_vm2, %v288_v38, -inf }
 0x298   :  { %v294_v40 = vmax.f32 %v292_v37, %v293_v39 }
 0x299   :  { %v461_v41 = vpop.f32.mrb[4].mxu1 }
 0x29a   :  { %v463_v42 = vpop.f32.mrb[5].mxu1  ;;  %295 = vmax.xlane.f32.xlu1 %v294_v40  ;;  %v462_v43 = vadd.f32 %v461_v41, %v40_v9 }
 0x29b   :  { %v464_v44 = vadd.f32 %v463_v42, %v40_v9 }
 0x29c   :  { %v472_v49 = vmax.f32 %v462_v43, 0.0 }
 0x29d   :  { %v467_v45 = vpop.f32.mrb[6].mxu1  ;;  %v473_v51 = vmax.f32 %v464_v44, 0.0 }
 0x29e   :  { %v468_v46 = vadd.f32 %v467_v45, %v45_v13  ;;  %v469_v47 = vpop.f32.mrb[7].mxu1 }
 0x29f   :  { %v470_v48 = vadd.f32 %v469_v47, %v45_v13 }
 0x2a0   :  { %v474_v50 = vmax.f32 %v468_v46, 0.0 }
 0x2a1   :  { %v475_v52 = vmax.f32 %v470_v48, 0.0 }
 0x2a2   :  { %v748_v53 = vpack.c.bf16 %v474_v50, %v472_v49 }
 0x2a3   :  { %v746_v54 = vpack.c.bf16 %v475_v52, %v473_v51 }
 0x2a5   :  { %747 = vmatprep.subr.bf16.mxu0 %v746_v54 }
 0x327   :  { %v296_v55 = vpop.xlane.xlu1 %295 }
 0x328   :  { %v297_v56 = vsub.f32 %v286_v36, %v296_v55  ;;  %v298_v57 = vsub.f32 %v288_v38, %v296_v55 }
 0x32a   :  { %v299_v58 = vmul.f32 1.442695, %v297_v56  ;;  %v301_v59 = vmul.f32 1.442695, %v298_v57 }
 0x32c   :  { %755 = vpow2.f32 %v299_v58 }
 0x32d   :  { %757 = vpow2.f32 %v301_v59 }
 0x336   :  { %v756_v60 = vpop.eup %755 }
 0x337   :  { %v758_v61 = vpop.eup %757  ;;  %v303_v62 = vsel %vm291_vm2, %v756_v60, 0.0 }
 0x338   :  { %v304_v63 = vsel %vm291_vm2, %v758_v61, 0.0 }
 0x339   :  { %v305_v0 = vadd.f32 %v304_v63, %v303_v62 }
 0x33b   :  { %306 = vadd.xlane.f32.xlu0 %v305_v0 }
 0x3c8   :  { %v307_v1 = vpop.xlane.xlu0 %306 }
 0x3c9   :  { %759 = vrcp.f32 %v307_v1 }
 0x3d3   :  { %v760_v2 = vpop.eup %759 }
 0x3d4   :  { %v309_v4 = vmul.f32 %v760_v2, %v756_v60  ;;  %v310_v5 = vmul.f32 %v760_v2, %v758_v61 }
 0x3d6   :  { %375 = vmatprep.mubr.f32.mxu0 %v310_v5 }
 0x3d7   :  { %376 = vmatmul.mubr.f32.vlgmr.msra.gmra.mrb[4].mxu0 %v309_v4 }
 0x3d8   :  { %749 = vmatpush1.bf16.msra.mxu0 %v748_v53  ;;  %540 = vmatprep.mubr.f32.mxu0 %v791_v3 }
 0x3db   :  { %740 = vmatmul.mubr.msk.f32.vlgmr.msra.gmra.mrb[6].mxu0 %vm140_vm1, %v863_v25 }
 0x3dc   :  { %613 = vmatprep.mubr.f32.mxu0 %v791_v3 }
 0x4aa   :  { %v377_v7 = vpop.f32.mrb[4].mxu0 }
 0x4ab   :  { %v381_v8 = vmul.f32 %v377_v7, %v34_v6  ;;  %v379_v9 = vpop.f32.mrb[5].mxu0 }
 0x4ad   :  { %v383_v10 = vsel %vm382_vm3, %v381_v8, 0.0 }
 0x4ae   :  { %v384_v11 = vrot.slane %v383_v10, 4  ;;  %v542_v12 = vpop.f32.mrb[6].mxu0 }
 0x4af   :  { %v543_v13 = vadd.f32 %v542_v12, %v868_v26  ;;  %v544_v14 = vpop.f32.mrb[7].mxu0 }
 0x4b0   :  { %v385_v15 = vadd.f32 %v384_v11, %v383_v10  ;;  %v545_v16 = vadd.f32 %v544_v14, %v868_v26 }
 0x4b1   :  { %v547_v18 = vmax.f32 %v543_v13, 0.0 }
 0x4b2   :  { %v386_v17 = vrot.slane %v385_v15, 2  ;;  %v548_v3 = vmax.f32 %v545_v16, 0.0 }
 0x4b4   :  { %v387_v19 = vadd.f32 %v386_v17, %v385_v15  ;;  %549 = vmatprep.subr.mxu0 %v548_v3 }
 0x4b5   :  { %550 = vmatpush1.msra.mxu0 %v547_v18 }
 0x4b6   :  { %741 = vmatmul.mubr.msk.f32.vlgmr.msra.gmra.mrb[8].mxu0 %vm47_vm0, %v875_v33  ;;  %v388_v20 = vrot.slane %v387_v19, 1 }
 0x4b8   :  { %v389_v21 = vadd.f32 %v388_v20, %v387_v19 }
 0x4ba   :  { %391 = vst.msk [vmem:[#allocation2] sm:$0x1] %vm390_vm4, %v389_v21 }
 0x589   :  { %v615_v22 = vpop.f32.mrb[8].mxu0 }
 0x58a   :  { %v620_v23 = vsel %vm291_vm2, %v615_v22, -inf  ;;  %v617_v24 = vpop.f32.mrb[9].mxu0 }
 0x58b   :  { %v621_v25 = vsel %vm291_vm2, %v617_v24, -inf }
 0x58c   :  { %v622_v26 = vmax.f32 %v620_v23, %v621_v25 }
 0x58e   :  { %623 = vmax.xlane.f32.xlu0 %v622_v26 }
 0x61b   :  { %v624_v27 = vpop.xlane.xlu0 %623 }
 0x61c   :  { %v625_v28 = vsub.f32 %v615_v22, %v624_v27  ;;  %v626_v29 = vsub.f32 %v617_v24, %v624_v27 }
 0x61e   :  { %v627_v30 = vmul.f32 1.442695, %v625_v28  ;;  %v629_v31 = vmul.f32 1.442695, %v626_v29 }
 0x620   :  { %761 = vpow2.f32 %v627_v30 }
 0x621   :  { %763 = vpow2.f32 %v629_v31 }
 0x62a   :  { %v762_v32 = vpop.eup %761 }
 0x62b   :  { %v764_v33 = vpop.eup %763  ;;  %v631_v34 = vsel %vm291_vm2, %v762_v32, 0.0 }
 0x62c   :  { %v632_v35 = vsel %vm291_vm2, %v764_v33, 0.0 }
 0x62d   :  { %v633_v36 = vadd.f32 %v632_v35, %v631_v34 }
 0x62f   :  { %634 = vadd.xlane.f32.xlu1 %v633_v36 }
 0x6bc   :  { %v635_v37 = vpop.xlane.xlu1 %634 }
 0x6bd   :  { %765 = vrcp.f32 %v635_v37 }
 0x6c7   :  { %v766_v38 = vpop.eup %765 }
 0x6c8   :  { %v637_v39 = vmul.f32 %v766_v38, %v762_v32  ;;  %v638_v40 = vmul.f32 %v766_v38, %v764_v33 }
 0x6ca   :  { %703 = vmatprep.mubr.f32.mxu1 %v638_v40 }
 0x6cb   :  { %704 = vmatmul.mubr.f32.vlgmr.msra.gmra.mrb[8].mxu1 %v637_v39 }
 0x79e   :  { %v705_v41 = vpop.f32.mrb[8].mxu1 }
 0x79f   :  { %v709_v42 = vmul.f32 %v705_v41, %v34_v6  ;;  %v707_v43 = vpop.f32.mrb[9].mxu1 }
 0x7a1   :  { %v710_v44 = vsel %vm382_vm3, %v709_v42, 0.0 }
 0x7a2   :  { %v711_v45 = vrot.slane %v710_v44, 4 }
 0x7a4   :  { %v712_v46 = vadd.f32 %v711_v45, %v710_v44 }
 0x7a6   :  { %v713_v47 = vrot.slane %v712_v46, 2 }
 0x7a8   :  { %v714_v48 = vadd.f32 %v713_v47, %v712_v46 }
 0x7aa   :  { %v715_v49 = vrot.slane %v714_v48, 1 }
 0x7ac   :  { %v716_v50 = vadd.f32 %v715_v49, %v714_v48 }
 0x7ae   :  { %717 = vst.msk [vmem:[#allocation2 + $0x1] sm:$0x1] %vm390_vm4, %v716_v50 }
 0x7af   :  { %778 = shalt.err (!%p775_p4)
}
 0x7b0   :  { %s779_s23 = scalar_lea.hbm %s931_s7, 32 }
 0x7b1   :  { %p780_p5 = scmp.ne.s32.totalorder %s931_s7, %s779_s23  ;;  %p783_p6 = scmp.lt.u32.totalorder %s779_s23, %s931_s7 }
 0x7b3   :  { %p785_p7 = pnand %p783_p6, %p780_p5 }
 0x7b5   :  { %788 = shalt.err (!%p785_p7)
}
 0x7b6   :  { %727 = dma.vmem_to_hbm [thread:$0]  %s725_s19, 32, %s931_s7, [#allocation3]  }
 0x7b7   :  { %789 = dma.done.wait [#allocation3], 32  }
 0x7b8   :  { %790 = vsyncadd [#allocation3], 4294967264 }
 0x7b9   :  { %731 = vsyncpa [#allocation3], 1 }

</bundles_post_ra>
